<compile_context>
chip_gen: v7x
topology: tpu7x:2x2x1
jax: 0.10.0
libtpu: 0.0.40
codegen_flags: <defaults>
</compile_context>

<pallas_src>
import functools

import jax
import jax.numpy as jnp
from jax import lax
from jax.experimental import pallas as pl
from jax.experimental.pallas import tpu as pltpu

K_TAPS = 5    # Conv1d kernel size
PAD = 2       # Conv1d padding (same-length output)
BN_EPS = 1e-5


def _conv_bn_relu_kernel(x_ref, w_ref, shift_ref, o_ref, *, tile_l, n_lt):
    """One (batch, length-tile) block of ReLU(BN(Conv1d(x))). Dropout=identity.

    x_ref:     (1, C_in, l_pad + 2*PAD)  full zero-padded row (resident per batch)
    w_ref:     (C_out, K*C_in)           conv taps stacked, BN scale folded in
    shift_ref: (C_out, 1)                conv bias + BN shift (f32)
    o_ref:     (1, C_out, tile_l)
    """
    # Static base offset when the length grid is collapsed (the common case);
    # dynamic (but tile-aligned) otherwise.
    base = 0 if n_lt == 1 else pl.multiple_of(pl.program_id(1) * tile_l, tile_l)

    # im2col: stack the K shifted windows along sublanes -> (K*C_in, tile_l).
    xs = jnp.concatenate(
        [x_ref[0, :, pl.ds(base + k, tile_l)] for k in range(K_TAPS)], axis=0)

    # Single deep MXU matmul (contraction depth K*C_in), f32 accumulation.
    y = jnp.dot(w_ref[...], xs, preferred_element_type=jnp.float32)
    y = jnp.maximum(y + shift_ref[...], 0.0)      # conv bias + BN shift, ReLU
    # Dropout(p=0.5) is the identity in eval mode.
    o_ref[0] = y.astype(o_ref.dtype)


def conv_block(x, w, b, gamma, beta, running_mean, running_var, *,
               eps=BN_EPS, compute_dtype=jnp.bfloat16, max_tile_l=1024):
    """ConvBlock forward (inference). x: (B, C, L); w: (C, C, 5); rest: (C,)."""
    B, C, L = x.shape
    assert w.shape == (C, C, K_TAPS)

    # Lane-dense length tiling: output length rounded up to a 128 multiple,
    # split into as few (<= max_tile_l wide) tiles as possible.
    l128 = pl.cdiv(L, 128) * 128
    n_lt = pl.cdiv(l128, max_tile_l)
    tile_l = pl.cdiv(l128 // 128, n_lt) * 128
    l_pad = n_lt * tile_l
    w_in = l_pad + 2 * PAD            # padded input row width (conv halo incl.)

    # Fold conv bias + inference BatchNorm:
    #   y = (scale ⊙ W) * x + shift,   scale = gamma / sqrt(var + eps)
    inv_std = lax.rsqrt(running_var.astype(jnp.float32) + eps)
    scale = gamma.astype(jnp.float32) * inv_std                       # (C,)
    shift = ((b.astype(jnp.float32) - running_mean.astype(jnp.float32)) * scale
             + beta.astype(jnp.float32))[:, None]                     # (C, 1)

    # Stack the taps: W' of shape (C_out, K*C_in); row-major over (k, c_in)
    # to match the in-kernel concat order.  BN scale folded per out-channel.
    w_folded = w.astype(jnp.float32) * scale[:, None, None]           # (C, C, K)
    w_stack = (jnp.transpose(w_folded, (0, 2, 1))                     # (C, K, C)
               .reshape(C, K_TAPS * C)).astype(compute_dtype)

    # Zero-pad (conv halo + length round-up) and cast in one fused wrapper op.
    x_pad = jnp.pad(x.astype(compute_dtype),
                    ((0, 0), (0, 0), (PAD, w_in - PAD - L)))

    in_itemsize = jnp.dtype(compute_dtype).itemsize
    out_itemsize = jnp.dtype(x.dtype).itemsize
    cost = pl.CostEstimate(
        flops=2 * B * C * (K_TAPS * C) * l_pad,
        transcendentals=0,
        bytes_accessed=int(x_pad.size) * in_itemsize
        + int(w_stack.size) * in_itemsize
        + C * 4
        + B * C * l_pad * out_itemsize,
    )

    out = pl.pallas_call(
        functools.partial(_conv_bn_relu_kernel, tile_l=tile_l, n_lt=n_lt),
        out_shape=jax.ShapeDtypeStruct((B, C, l_pad), x.dtype),
        grid_spec=pltpu.PrefetchScalarGridSpec(
            num_scalar_prefetch=0,
            grid=(B, n_lt),
            in_specs=[
                # Full padded row per batch element; constant along the length
                # axis -> DMA'd once per batch row, no halo duplication.
                pl.BlockSpec((1, C, w_in), lambda bi, li: (bi, 0, 0)),
                # Stacked, BN-folded weights and the per-channel shift:
                # constant index_maps -> resident, fetched once.
                pl.BlockSpec((C, K_TAPS * C), lambda bi, li: (0, 0)),
                pl.BlockSpec((C, 1), lambda bi, li: (0, 0)),
            ],
            out_specs=pl.BlockSpec((1, C, tile_l), lambda bi, li: (bi, 0, li)),
        ),
        compiler_params=pltpu.CompilerParams(
            dimension_semantics=("parallel", "arbitrary"),
        ),
        cost_estimate=cost,
    )(x_pad, w_stack, shift)

    return out[:, :, :L]


if __name__ == "__main__":
    dim, batch, length = 32, 2, 256

    key = jax.random.PRNGKey(0)
    kx, kw, kb, kg, kbe, km, kv = jax.random.split(key, 7)

    x = jax.random.normal(kx, (batch, dim, length), dtype=jnp.float32)
    w = 0.1 * jax.random.normal(kw, (dim, dim, K_TAPS), dtype=jnp.float32)
    b = 0.1 * jax.random.normal(kb, (dim,), dtype=jnp.float32)
    gamma = 1.0 + 0.1 * jax.random.normal(kg, (dim,), dtype=jnp.float32)
    beta = 0.1 * jax.random.normal(kbe, (dim,), dtype=jnp.float32)
    running_mean = 0.1 * jax.random.normal(km, (dim,), dtype=jnp.float32)
    running_var = jax.random.uniform(kv, (dim,), dtype=jnp.float32,
                                     minval=0.5, maxval=1.5)

    out = jax.block_until_ready(
        conv_block(x, w, b, gamma, beta, running_mean, running_var))

    # Plain-JAX reference (eval mode: BN running stats, dropout = identity).
    # Mirror the kernel's bf16 quantisation of x and of the scale-folded
    # weights so the check isolates structural correctness (conv indexing,
    # padding, BN/bias fold, ReLU) from expected bf16 rounding.
    inv_std = lax.rsqrt(running_var + BN_EPS)
    scale = gamma * inv_std
    shift = (b - running_mean) * scale + beta
    w_q = (w * scale[:, None, None]).astype(jnp.bfloat16).astype(jnp.float32)
    x_q = x.astype(jnp.bfloat16).astype(jnp.float32)
    conv_ref = lax.conv_general_dilated(
        x_q, w_q, window_strides=(1,), padding=[(PAD, PAD)],
        dimension_numbers=("NCH", "OIH", "NCH"),
        precision=lax.Precision.HIGHEST)
    ref = jnp.maximum(conv_ref + shift[None, :, None], 0.0)

    assert out.shape == (batch, dim, length)
    err = float(jnp.max(jnp.abs(out - ref)))
    assert jnp.allclose(out, ref, atol=2e-2, rtol=2e-2), f"mismatch: max abs err={err}"

    print("KERNEL_OK")
</pallas_src>

<mosaic_0001>
module attributes {stable_mosaic.version = 11 : i64} {
  func.func @_conv_bn_relu_kernel(%arg0: i32, %arg1: i32, %arg2: memref<1x32x260xbf16, #tpu.memory_space<vmem>>, %arg3: memref<32x160xbf16, #tpu.memory_space<vmem>>, %arg4: memref<32x1xf32, #tpu.memory_space<vmem>>, %arg5: memref<1x32x256xf32, #tpu.memory_space<vmem>>) attributes {dimension_semantics = [#tpu.dimension_semantics<parallel>, #tpu.dimension_semantics<arbitrary>], iteration_bounds = array<i64: 2, 1>, scalar_prefetch = 0 : i64, scratch_operands = 0 : i64, tpu.core_type = #tpu.core_type<tc>, window_params = [{transform_indices = @transform_0, window_bounds = array<i64: 1, 32, 260>}, {pipeline_mode = #tpu.pipeline_mode<synchronous>, transform_indices = @transform_1, window_bounds = array<i64: 32, 160>}, {pipeline_mode = #tpu.pipeline_mode<synchronous>, transform_indices = @transform_2, window_bounds = array<i64: 32, 1>}, {transform_indices = @transform_3, window_bounds = array<i64: 1, 32, 256>}]} {
    %c0 = arith.constant 0 : index
    %c0_0 = arith.constant 0 : index
    %c0_1 = arith.constant 0 : index
    %0 = vector.load %arg2[%c0, %c0_0, %c0_1] : memref<1x32x260xbf16, #tpu.memory_space<vmem>>, vector<1x32x256xbf16>
    %1 = vector.shape_cast %0 : vector<1x32x256xbf16> to vector<32x256xbf16>
    %c0_2 = arith.constant 0 : index
    %c0_3 = arith.constant 0 : index
    %c1 = arith.constant 1 : index
    %2 = vector.load %arg2[%c0_2, %c0_3, %c1] : memref<1x32x260xbf16, #tpu.memory_space<vmem>>, vector<1x32x256xbf16>
    %3 = vector.shape_cast %2 : vector<1x32x256xbf16> to vector<32x256xbf16>
    %c0_4 = arith.constant 0 : index
    %c0_5 = arith.constant 0 : index
    %c2 = arith.constant 2 : index
    %4 = vector.load %arg2[%c0_4, %c0_5, %c2] : memref<1x32x260xbf16, #tpu.memory_space<vmem>>, vector<1x32x256xbf16>
    %5 = vector.shape_cast %4 : vector<1x32x256xbf16> to vector<32x256xbf16>
    %c0_6 = arith.constant 0 : index
    %c0_7 = arith.constant 0 : index
    %c3 = arith.constant 3 : index
    %6 = vector.load %arg2[%c0_6, %c0_7, %c3] : memref<1x32x260xbf16, #tpu.memory_space<vmem>>, vector<1x32x256xbf16>
    %7 = vector.shape_cast %6 : vector<1x32x256xbf16> to vector<32x256xbf16>
    %c0_8 = arith.constant 0 : index
    %c0_9 = arith.constant 0 : index
    %c4 = arith.constant 4 : index
    %8 = vector.load %arg2[%c0_8, %c0_9, %c4] : memref<1x32x260xbf16, #tpu.memory_space<vmem>>, vector<1x32x256xbf16>
    %9 = vector.shape_cast %8 : vector<1x32x256xbf16> to vector<32x256xbf16>
    %10 = tpu.concatenate %1, %3, %5, %7, %9 in 0 : vector<32x256xbf16>, vector<32x256xbf16>, vector<32x256xbf16>, vector<32x256xbf16>, vector<32x256xbf16> -> vector<160x256xbf16>
    %c0_10 = arith.constant 0 : index
    %c0_11 = arith.constant 0 : index
    %11 = vector.load %arg3[%c0_10, %c0_11] : memref<32x160xbf16, #tpu.memory_space<vmem>>, vector<32x160xbf16>
    %cst = arith.constant dense<0.000000e+00> : vector<32x256xf32>
    %12 = tpu.matmul %11, %10, %cst {dimension_numbers = #tpu.dot_dimension_numbers<[1], [0], [0], [1], [0, 0, 1, 1], [], []>} : vector<32x160xbf16>, vector<160x256xbf16>, vector<32x256xf32> -> vector<32x256xf32>
    %c0_12 = arith.constant 0 : index
    %c0_13 = arith.constant 0 : index
    %13 = vector.load %arg4[%c0_12, %c0_13] : memref<32x1xf32, #tpu.memory_space<vmem>>, vector<32x1xf32>
    %14 = vector.broadcast %13 : vector<32x1xf32> to vector<32x256xf32>
    %15 = arith.addf %12, %14 : vector<32x256xf32>
    %cst_14 = arith.constant 0.000000e+00 : f32
    %16 = vector.broadcast %cst_14 : f32 to vector<32x256xf32>
    %17 = arith.maximumf %15, %16 : vector<32x256xf32>
    %c0_15 = arith.constant 0 : index
    %c0_16 = arith.constant 0 : index
    %c0_17 = arith.constant 0 : index
    %18 = vector.load %arg5[%c0_15, %c0_16, %c0_17] : memref<1x32x256xf32, #tpu.memory_space<vmem>>, vector<1x32x256xf32>
    %19 = vector.shape_cast %18 : vector<1x32x256xf32> to vector<32x256xf32>
    %20 = vector.shape_cast %17 : vector<32x256xf32> to vector<1x32x256xf32>
    tpu.vector_store %arg5[%c0_15, %c0_16, %c0_17], %20 {strides = array<i32>} : memref<1x32x256xf32, #tpu.memory_space<vmem>>, vector<1x32x256xf32>,
    return
  }
  func.func @transform_0(%arg0: i32, %arg1: i32) -> (i32, i32, i32) {
    %c0_i32 = arith.constant 0 : i32
    %c0_i32_0 = arith.constant 0 : i32
    %c0_i32_1 = arith.constant 0 : i32
    return %arg0, %c0_i32, %c0_i32_0 : i32, i32, i32
  }
  func.func @transform_1(%arg0: i32, %arg1: i32) -> (i32, i32) {
    %c0_i32 = arith.constant 0 : i32
    %c0_i32_0 = arith.constant 0 : i32
    %c0_i32_1 = arith.constant 0 : i32
    return %c0_i32, %c0_i32_0 : i32, i32
  }
  func.func @transform_2(%arg0: i32, %arg1: i32) -> (i32, i32) {
    %c0_i32 = arith.constant 0 : i32
    %c0_i32_0 = arith.constant 0 : i32
    %c0_i32_1 = arith.constant 0 : i32
    return %c0_i32, %c0_i32_0 : i32, i32
  }
  func.func @transform_3(%arg0: i32, %arg1: i32) -> (i32, i32, i32) {
    %c0_i32 = arith.constant 0 : i32
    %c0_i32_0 = arith.constant 0 : i32
    return %arg0, %c0_i32, %arg1 : i32, i32, i32
  }
}

</mosaic_0001>

<bundles_post_ra>
// kernel: tpu_custom_call.1
= control target key start
LH: loop header
LB: loop body
LE: loop exit
PB: predicated region body
PF: predicated region fallthrough
CT: control target
= control target key end

     0   :  { %8 = vsyncpa [#allocation3], 0  ;;  %s1052_s0 = inlined_call_operand.hbm [shape: bf16[2,32,260], index: 0, kind: input, shape index: {}]   ;;  %s1053_s1 = inlined_call_operand.vmem [shape: bf16[32,160], index: 1, kind: input, shape index: {}]   ;;  %s1054_s2 = inlined_call_operand.vmem [shape: f32[32,1], index: 2, kind: input, shape index: {}]   ;;  %s1055_s3 = inlined_call_operand.hbm [shape: f32[2,32,256], index: 3, kind: output, shape index: {}]  }
   0x1   :  { %10 = vsyncpa [#allocation3 + $0x1], 0 }
   0x2   :  { %11 = vsyncpa [#allocation4], 0 }
   0x3   :  { %13 = vsyncpa [#allocation4 + $0x1], 0  ;;  %s829_s12 = smov 0   ;;  %s831_s13 = smov 0  }
   0x4   :  { %s833_s14 = smov 0   ;;  %s835_s15 = smov 0  }
   0x5   :  { %s837_s16 = smov 0   ;;  %s839_s17 = smov 0  }
   0x6 LB: > { %s549_s18 = sadd.s32 4294967295, %s796_s17   ;;  %s550_s19 = sadd.s32 4294967294, %s796_s17   ;;  %s796_s17 = sphi %s839_s17, %s19_s17   ;;  %s792_s16 = sphi %s837_s16, %s1070_s16   ;;  %s788_s15 = sphi %s835_s15, %s1069_s15   ;;  %s784_s14 = sphi %s833_s14, %s1068_s14   ;;  %s780_s13 = sphi %s831_s13, %s1067_s13   ;;  %s776_s12 = sphi %s829_s12, %s1066_s12  }
   0x7   : > { %s31_s20 = sadd.s32 1, %s792_s16  ;;  %s38_s21 = sadd.s32 1, %s784_s14 }
   0x8   : > { %p33_p0 = scmp.ge.s32.totalorder %s31_s20, 2  ;;  %p45_p1 = scmp.ne.s32.totalorder %s784_s14, %s780_s13 }
   0x9   : > { %p46_p2 = scmp.eq.s32.totalorder %s796_s17, 0  ;;  %p51_p3 = scmp.ne.s32.totalorder %s780_s13, %s776_s12 }
   0xa   : > { %s1072_s20 = smov (%p33_p0, %s31_s20), 0  ;;  %p52_p5 = scmp.eq.s32.totalorder %s549_s18, 0 }
   0xb   : > { %p870_p4 = por %p46_p2, %p45_p1  ;;  %s35_s23 = ssub.s32 %s792_s16, %s1072_s20 }
   0xc   : > { %p119_p6 = scmp.eq.s32.totalorder %s549_s18, 1  ;;  %p36_p7 = scmp.eq.s32.totalorder %s35_s23, 0 }
   0xd   : > { %p876_p8 = por %p52_p5, %p51_p3  ;;  %p125_p10 = scmp.eq.s32.totalorder %s550_s19, 1 }
   0xe   : > { %p880_p9 = por %p119_p6, %p45_p1  ;;  %p609_p13 = scmp.lt.s32.totalorder %s796_s17, 2 }
   0xf   : > { %s885_s26 = scalar_select %p36_p7, %s784_s14, %s38_s21  }
  0x10   : > { %s1059_s25 = scalar_select %p880_p9, 1, 0 }
  0x11   : > { %p887_p11 = por %p125_p10, %p51_p3  ;;  %s151_s28 = sand.u32 1, %s784_s14  }
  0x12   : > { %s594_s29 = smul.u32 48, %s151_s28  ;;  %p897_p0 = pnand %p609_p13, %p870_p4 }
  0x13   : > { %s1060_s27 = scalar_select %p887_p11, 1, 0 }
  0x14   : > { %s595_s30 = smul.u32 768, %s792_s16  ;;  %s155_s8 = scalar_lea.vmem [#allocation2], %s594_s29 }
  0x15   : > { %s162_s9 = sshll.u32 %s155_s8, 4  ;;  %s909_s10 = scalar_lea.sflag [#allocation3], %s151_s28  ;;  %s906_s9 = int_to_ptr.vmem [resolvable:$true] %s162_s9 }
  0x16   : > { %s904_s7 = scalar_lea.hbm %s1052_s0, %s595_s30  ;;  %p686_p3 = pneg %p897_p0 }
  0x17   : > { %s684_s11 = scalar_lea.hbm %s904_s7, 768  ;;  %s689_s21 = scalar_lea.hbm %s1052_s0, 1536 }
  0x18   : > { %p685_p2 = scmp.ne.s32.totalorder %s904_s7, %s684_s11  ;;  %p690_p6 = scmp.lt.u32.totalorder %s904_s7, %s1052_s0 }
  0x19   : > { %p691_p7 = scmp.lt.u32.totalorder %s689_s21, %s684_s11  ;;  %p693_p13 = scmp.lt.u32.totalorder %s684_s11, %s904_s7 }
  0x1a   : > { %p687_p4 = pnand %p686_p3, %p685_p2 }
  0x1b   : > { %p692_p10 = por %p691_p7, %p690_p6 }
  0x1c   : > { %p688_p5 = pneg %p687_p4 }
  0x1d   : > { %p694_p12 = por %p693_p13, %p692_p10 }
  0x1f   : > { %p695_p1 = pnand %p694_p12, %p688_p5 }
  0x21   : > { %698 = shalt.err (!%p695_p1)
}
  0x22   : > { %s699_s28 = scalar_lea.vmem %s906_s9, 768  ;;  %s798_s29 = smov [#allocation2]  }
  0x23   : > { %p700_p2 = scmp.ne.s32.totalorder %s906_s9, %s699_s28  ;;  %s704_s30 = sshll.u32 %s798_s29, 4  ;;  %s705_s30 = int_to_ptr.vmem [resolvable:$false] %s704_s30 }
  0x24   : > { %s706_s5 = scalar_lea.vmem %s705_s30, 1536  ;;  %p707_p9 = scmp.lt.s32.totalorder %s906_s9, %s705_s30 }
  0x25   : > { %p702_p4 = pnand %p700_p2, %p686_p3  ;;  %p708_p6 = scmp.lt.s32.totalorder %s706_s5, %s699_s28 }
  0x27   : > { %p703_p11 = pneg %p702_p4  ;;  %p709_p7 = por %p708_p6, %p707_p9 }
  0x29   : > { %p710_p10 = pnand %p709_p7, %p703_p11 }
  0x2b   : > { %713 = shalt.err (!%p710_p10)
}
  0x2c   : > { %s799_s6 = smov 192   ;;  %s800_s8 = smov 12  }
  0x2d   : > { %604 = dma.hbm_to_vmem [thread:$0]  (!%p897_p0), %s904_s7, 768, %s906_s9, %s909_s10, %s799_s6, %s799_s6, %s800_s8  }
  0x2e   : > { %p170_p12 = scmp.lt.s32.totalorder %s796_s17, 3  ;;  %p1062_p1 = scmp.ge.s32.totalorder %s796_s17, 1 }
  0x30   : > { %p171_p3 = pnand %p1062_p1, %p170_p12 }
  0x31   : > { %s941_s11 = sand.u32 (!%p171_p3), 1, %s780_s13  }
  0x32   : > { %174 = sbr.rel (%p171_p3) target bundleno = 457 (0x1c9), region = 32  ;;  %s177_s19 = scalar_lea.sflag (!%p171_p3), [#allocation3], %s941_s11 }
  0x33   : > { %s596_s18 = smul.u32 (!%p171_p3), 48, %s941_s11 }
  0x35   : > { %s180_s21 = scalar_lea.vmem (!%p171_p3), [#allocation2], %s596_s18 }
  0x39   : > { %767 = dma.done.wait (%p876_p8), %s177_s19, 768  }
  0x3a   : > { %769 = vsyncadd (%p876_p8), %s177_s19, 4294966528  ;;  %v670_v0 = vld [vmem:[%s180_s21 + $0x4] ss:$12 sps:$4 sm:$0xff]   ;;  %v672_v1 = vld [vmem:[%s180_s21] ss:$12 sps:$4 sm:$0xff]   ;;  %s801_s4 = smov 127  }
  0x3b   : > { %245 = vrot.lane.b32.xlu0 %v670_v0, %s801_s4  ;;  %v673_v2 = vld [vmem:[%s180_s21 + $0x8] ss:$12 sps:$4 sm:$0xff]   ;;  %380 = vmatprep.subr.bf16.mxu0 %v670_v0  ;;  %v676_v4 = vld [vmem:[%s180_s21 + $0x20] ss:$12 sps:$4 sm:$0xff]   ;;  %v677_v5 = vld [vmem:[%s180_s21 + $0x18] ss:$12 sps:$4 sm:$0xff]  }
  0x3c   : > { %243 = vrot.lane.b32.xlu1 %v672_v1, %s801_s4  ;;  %v674_v3 = vld [vmem:[%s180_s21 + $0x1c] ss:$12 sps:$4 sm:$0xff]   ;;  %574 = vmatprep.subr.bf16.mxu1 %v670_v0  ;;  %s802_s24 = smov 126   ;;  %s803_s7 = smov 125   ;;  %vm373_vm0 = vcmask 261120   ;;  %v805_v8 = vmov 0  }
  0x3d   : > { %381 = vmatpush1.bf16.msra.mxu0 %v672_v1  ;;  %584 = vmatpush1.bf16.msra.mxu1 %v672_v1  ;;  %v680_v6 = vld [vmem:[%s1053_s1 + $0x4] ss:$8 sps:$4 sm:$0xff]   ;;  %v683_v7 = vld [vmem:[%s1053_s1 + $0x14] ss:$8 sps:$4 sm:$0xff]   ;;  %s804_s28 = smov 124   ;;  %vm255_vm1 = vcmask 1039360  }
  0x3e   : > { %382 = vmatprep.subr.bf16.mxu0 %v674_v3  ;;  %575 = vmatprep.subr.bf16.mxu1 %v674_v3  ;;  %v331_v9 = vld [vmem:[%s1054_s2] sm:$0xff]  ;;  %v332_v10 = vld [vmem:[%s1054_s2 + $0x8] sm:$0xff]  ;;  %v334_v11 = vld [vmem:[%s1054_s2 + $0x18] sm:$0xff]  ;;  %vm276_vm2 = vcmask 1031168   ;;  %vm297_vm3 = vcmask 1022976   ;;  %vm318_vm4 = vcmask 1014784  }
  0x3f   : > { %247 = vrot.lane.b32.xlu0 %v673_v2, %s801_s4  ;;  %566 = vmatprep.mubr.msk.bf16.mxu0 %vm373_vm0, %v680_v6  ;;  %v333_v12 = vld [vmem:[%s1054_s2 + $0x10] sm:$0xff]  ;;  %v678_v53 = vld [vmem:[%s1053_s1] ss:$8 sps:$4 sm:$0xff]   ;;  %s555_s10 = sshll.u32 %s941_s11, 6  ;;  %s450_s5 = scalar_lea.sflag [#allocation4], %s941_s11 }
  0x40   : > { %251 = vrot.lane.b32.xlu1 %v674_v3, %s801_s4  ;;  %567 = vmatprep.mubr.msk.bf16.mxu1 %vm373_vm0, %v683_v7  ;;  %v681_v54 = vld [vmem:[%s1053_s1 + $0x10] ss:$8 sps:$4 sm:$0xff]   ;;  %s986_s22 = scalar_lea.vmem [#allocation5], %s555_s10  ;;  %p1063_p9 = scmp.ne.s32.totalorder %s1059_s25, 0 }
  0x41   : > { %383 = vmatpush1.bf16.msra.mxu0 %v677_v5  ;;  %585 = vmatpush1.bf16.msra.mxu1 %v677_v5  ;;  %s465_s23 = sshll.u32 %s986_s22, 4  ;;  %s806_s8 = smov [#allocation5]   ;;  %s990_s23 = int_to_ptr.vmem [resolvable:$true] %s465_s23 }
  0x42   : > { %668 = vset.pattern.permute.xlu0 %v805_v8  ;;  %669 = vset.pattern.permute.xlu1 %v805_v8  ;;  %s714_s6 = scalar_lea.vmem %s990_s23, 1024  ;;  %s718_s18 = sshll.u32 %s806_s8, 4  ;;  %s719_s18 = int_to_ptr.vmem [resolvable:$false] %s718_s18 }
  0x43   : > { %253 = vrot.lane.b32.xlu0 %v676_v4, %s801_s4  ;;  %p715_p8 = scmp.ne.s32.totalorder %s990_s23, %s714_s6  ;;  %s720_s19 = scalar_lea.vmem %s719_s18, 2048 }
  0x44   : > { %249 = vrot.lane.b32.xlu1 %v677_v5, %s801_s4  ;;  %p721_p5 = scmp.lt.s32.totalorder %s990_s23, %s719_s18  ;;  %p722_p13 = scmp.lt.s32.totalorder %s720_s19, %s714_s6 }
  0x45   : > { %p716_p11 = pnand %p715_p8, %p1063_p9 }
  0x46   : > { %p723_p2 = por %p722_p13, %p721_p5 }
  0x47   : > { %266 = vrot.lane.b32.xlu0 %v670_v0, %s802_s24  ;;  %p717_p0 = pneg %p716_p11 }
  0x48   : > { %268 = vrot.lane.b32.xlu1 %v673_v2, %s802_s24 }
  0x49   : > { %p724_p4 = pnand %p723_p2, %p717_p0 }
  0x4b   : > { %264 = vrot.lane.b32.xlu0 %v672_v1, %s802_s24 }
  0x4c   : > { %272 = vrot.lane.b32.xlu1 %v674_v3, %s802_s24 }
  0x4f   : > { %274 = vrot.lane.b32.xlu0 %v676_v4, %s802_s24 }
  0x50   : > { %270 = vrot.lane.b32.xlu1 %v677_v5, %s802_s24 }
  0x53   : > { %287 = vrot.lane.b32.xlu0 %v670_v0, %s803_s7 }
  0x54   : > { %289 = vrot.lane.b32.xlu1 %v673_v2, %s803_s7 }
  0x57   : > { %285 = vrot.lane.b32.xlu0 %v672_v1, %s803_s7 }
  0x58   : > { %293 = vrot.lane.b32.xlu1 %v674_v3, %s803_s7 }
  0x5b   : > { %295 = vrot.lane.b32.xlu0 %v676_v4, %s803_s7 }
  0x5c   : > { %291 = vrot.lane.b32.xlu1 %v677_v5, %s803_s7 }
  0x5f   : > { %308 = vrot.lane.b32.xlu0 %v670_v0, %s804_s28 }
  0x60   : > { %310 = vrot.lane.b32.xlu1 %v673_v2, %s804_s28 }
  0x63   : > { %306 = vrot.lane.b32.xlu0 %v672_v1, %s804_s28 }
  0x64   : > { %314 = vrot.lane.b32.xlu1 %v674_v3, %s804_s28 }
  0x67   : > { %316 = vrot.lane.b32.xlu0 %v676_v4, %s804_s28 }
  0x68   : > { %312 = vrot.lane.b32.xlu1 %v677_v5, %s804_s28  ;;  %s573_s28 = sshll.u32 %s788_s15, 10 }
  0x69   : > { %s997_s30 = scalar_lea.hbm %s1055_s3, %s573_s28 }
  0x6b   : > { %337 = vperm.xlu0 %668, %v331_v9  }
  0x6c   : > { %342 = vperm.xlu1 %669, %v332_v10  }
  0x6f   : > { %352 = vperm.xlu0 %668, %v334_v11  }
  0x70   : > { %347 = vperm.xlu1 %669, %v333_v12  }
  0xad   : > { %v246_v13 = vpop.permute.xlu0 %245 }
  0xae   : > { %v244_v14 = vpop.permute.xlu1 %243 }
  0xaf   : > { %v256_v18 = vsel %vm255_vm1, %v244_v14, %v246_v13 }
  0xb1   : > { %v248_v15 = vpop.permute.xlu0 %247 }
  0xb2   : > { %v252_v16 = vpop.permute.xlu1 %251  ;;  %v257_v17 = vsel %vm255_vm1, %v246_v13, %v248_v15 }
  0xb3   : > { %384 = vmatprep.subr.bf16.mxu0 %v257_v17  ;;  %576 = vmatprep.subr.bf16.mxu1 %v257_v17 }
  0xb4   : > { %385 = vmatpush1.bf16.msra.mxu0 %v256_v18  ;;  %586 = vmatpush1.bf16.msra.mxu1 %v256_v18 }
  0xb5   : > { %v254_v19 = vpop.permute.xlu0 %253 }
  0xb6   : > { %v250_v20 = vpop.permute.xlu1 %249  ;;  %v259_v21 = vsel %vm255_vm1, %v252_v16, %v254_v19 }
  0xb7   : > { %386 = vmatprep.subr.bf16.mxu0 %v259_v21  ;;  %577 = vmatprep.subr.bf16.mxu1 %v259_v21  ;;  %v258_v22 = vsel %vm255_vm1, %v250_v20, %v252_v16 }
  0xb8   : > { %387 = vmatpush1.bf16.msra.mxu0 %v258_v22  ;;  %587 = vmatpush1.bf16.msra.mxu1 %v258_v22 }
  0xb9   : > { %v267_v23 = vpop.permute.xlu0 %266 }
  0xba   : > { %v269_v24 = vpop.permute.xlu1 %268 }
  0xbb   : > { %v278_v25 = vsel %vm276_vm2, %v267_v23, %v269_v24 }
  0xbc   : > { %388 = vmatprep.subr.bf16.mxu0 %v278_v25  ;;  %578 = vmatprep.subr.bf16.mxu1 %v278_v25 }
  0xbd   : > { %v265_v26 = vpop.permute.xlu0 %264 }
  0xbe   : > { %v273_v27 = vpop.permute.xlu1 %272  ;;  %v277_v28 = vsel %vm276_vm2, %v265_v26, %v267_v23 }
  0xbf   : > { %389 = vmatpush1.bf16.msra.mxu0 %v277_v28  ;;  %588 = vmatpush1.bf16.msra.mxu1 %v277_v28 }
  0xc1   : > { %v275_v29 = vpop.permute.xlu0 %274 }
  0xc2   : > { %v271_v30 = vpop.permute.xlu1 %270  ;;  %v280_v31 = vsel %vm276_vm2, %v273_v27, %v275_v29 }
  0xc3   : > { %390 = vmatprep.subr.bf16.mxu0 %v280_v31  ;;  %579 = vmatprep.subr.bf16.mxu1 %v280_v31  ;;  %v279_v32 = vsel %vm276_vm2, %v271_v30, %v273_v27 }
  0xc4   : > { %391 = vmatpush1.bf16.msra.mxu0 %v279_v32  ;;  %589 = vmatpush1.bf16.msra.mxu1 %v279_v32 }
  0xc5   : > { %v288_v33 = vpop.permute.xlu0 %287 }
  0xc6   : > { %v290_v34 = vpop.permute.xlu1 %289 }
  0xc7   : > { %v299_v35 = vsel %vm297_vm3, %v288_v33, %v290_v34 }
  0xc8   : > { %392 = vmatprep.subr.bf16.mxu0 %v299_v35  ;;  %580 = vmatprep.subr.bf16.mxu1 %v299_v35 }
  0xc9   : > { %v286_v36 = vpop.permute.xlu0 %285 }
  0xca   : > { %v294_v37 = vpop.permute.xlu1 %293  ;;  %v298_v38 = vsel %vm297_vm3, %v286_v36, %v288_v33 }
  0xcb   : > { %393 = vmatpush1.bf16.msra.mxu0 %v298_v38  ;;  %590 = vmatpush1.bf16.msra.mxu1 %v298_v38 }
  0xcd   : > { %v296_v39 = vpop.permute.xlu0 %295 }
  0xce   : > { %v292_v40 = vpop.permute.xlu1 %291  ;;  %v301_v41 = vsel %vm297_vm3, %v294_v37, %v296_v39 }
  0xcf   : > { %394 = vmatprep.subr.bf16.mxu0 %v301_v41  ;;  %581 = vmatprep.subr.bf16.mxu1 %v301_v41  ;;  %v300_v42 = vsel %vm297_vm3, %v292_v40, %v294_v37 }
  0xd0   : > { %395 = vmatpush1.bf16.msra.mxu0 %v300_v42  ;;  %591 = vmatpush1.bf16.msra.mxu1 %v300_v42 }
  0xd1   : > { %v309_v43 = vpop.permute.xlu0 %308 }
  0xd2   : > { %v311_v44 = vpop.permute.xlu1 %310 }
  0xd3   : > { %v320_v45 = vsel %vm318_vm4, %v309_v43, %v311_v44 }
  0xd4   : > { %396 = vmatprep.subr.bf16.mxu0 %v320_v45  ;;  %582 = vmatprep.subr.bf16.mxu1 %v320_v45 }
  0xd5   : > { %v307_v46 = vpop.permute.xlu0 %306 }
  0xd6   : > { %v315_v47 = vpop.permute.xlu1 %314  ;;  %v319_v48 = vsel %vm318_vm4, %v307_v46, %v309_v43 }
  0xd7   : > { %397 = vmatpush1.bf16.msra.mxu0 %v319_v48  ;;  %592 = vmatpush1.bf16.msra.mxu1 %v319_v48 }
  0xd9   : > { %v317_v49 = vpop.permute.xlu0 %316 }
  0xda   : > { %v313_v50 = vpop.permute.xlu1 %312  ;;  %v322_v51 = vsel %vm318_vm4, %v315_v47, %v317_v49 }
  0xdb   : > { %398 = vmatprep.subr.bf16.mxu0 %v322_v51  ;;  %583 = vmatprep.subr.bf16.mxu1 %v322_v51  ;;  %v321_v52 = vsel %vm318_vm4, %v313_v50, %v315_v47 }
  0xdc   : > { %399 = vmatpush1.bf16.msra.mxu0 %v321_v52  ;;  %593 = vmatpush1.bf16.msra.mxu1 %v321_v52 }
  0xdf   : > { %413 = vmatmul.mubr.bf16.vlgmr.msra.gmra.mrb[0].mxu0 %v678_v53  ;;  %423 = vmatmul.mubr.bf16.vlgmr.msra.gmra.mrb[0].mxu1 %v681_v54 }
  0xea   : > { %v338_v56 = vpop.permute.xlu0 %337 }
  0xeb   : > { %v343_v55 = vpop.permute.xlu1 %342 }
  0xee   : > { %v353_v58 = vpop.permute.xlu0 %352 }
  0xef   : > { %v348_v57 = vpop.permute.xlu1 %347 }
 0x1b2   : > { %v414_v59 = vpop.f32.mrb[0].mxu0  ;;  %v424_v60 = vpop.f32.mrb[0].mxu1 }
 0x1b3   : > { %v415_v61 = vadd.f32 %v414_v59, %v338_v56  ;;  %v425_v62 = vadd.f32 %v424_v60, %v348_v57  ;;  %v416_v63 = vpop.f32.mrb[1].mxu0  ;;  %v426_v0 = vpop.f32.mrb[1].mxu1 }
 0x1b4   : > { %v417_v1 = vadd.f32 %v416_v63, %v338_v56  ;;  %v427_v2 = vadd.f32 %v426_v0, %v348_v57  ;;  %v418_v3 = vpop.f32.mrb[2].mxu0  ;;  %v428_v4 = vpop.f32.mrb[2].mxu1 }
 0x1b5   : > { %v433_v5 = vmax.f32 %v415_v61, 0.0  ;;  %v437_v6 = vmax.f32 %v425_v62, 0.0  ;;  %v419_v7 = vadd.f32 %v418_v3, %v343_v55  ;;  %v429_v8 = vadd.f32 %v428_v4, %v353_v58  ;;  %v420_v9 = vpop.f32.mrb[3].mxu0  ;;  %v430_v10 = vpop.f32.mrb[3].mxu1 }
 0x1b6   : > { %v434_v11 = vmax.f32 %v417_v1, 0.0  ;;  %v438_v12 = vmax.f32 %v427_v2, 0.0  ;;  %v421_v13 = vadd.f32 %v420_v9, %v343_v55  ;;  %v431_v14 = vadd.f32 %v430_v10, %v353_v58 }
 0x1b7   : > { %441 = vst [vmem:[%s986_s22] sm:$0xff] %v433_v5  ;;  %445 = vst [vmem:[%s986_s22 + $0x20] sm:$0xff] %v437_v6  ;;  %v435_v15 = vmax.f32 %v419_v7, 0.0  ;;  %v439_v16 = vmax.f32 %v429_v8, 0.0 }
 0x1b8   : > { %442 = vst [vmem:[%s986_s22 + $0x8] sm:$0xff] %v434_v11  ;;  %446 = vst [vmem:[%s986_s22 + $0x28] sm:$0xff] %v438_v12  ;;  %v436_v17 = vmax.f32 %v421_v13, 0.0  ;;  %v440_v18 = vmax.f32 %v431_v14, 0.0 }
 0x1b9   : > { %443 = vst [vmem:[%s986_s22 + $0x10] sm:$0xff] %v435_v15  ;;  %447 = vst [vmem:[%s986_s22 + $0x30] sm:$0xff] %v439_v16 }
 0x1ba   : > { %444 = vst [vmem:[%s986_s22 + $0x18] sm:$0xff] %v436_v17  ;;  %448 = vst [vmem:[%s986_s22 + $0x38] sm:$0xff] %v440_v18 }
 0x1bb   : > { %727 = shalt.err (!%p724_p4)
}
 0x1bc   : > { %s728_s21 = scalar_lea.hbm %s997_s30, 1024  ;;  %s732_s7 = scalar_lea.hbm %s1055_s3, 2048 }
 0x1bd   : > { %p729_p6 = scmp.ne.s32.totalorder %s997_s30, %s728_s21  ;;  %p733_p12 = scmp.lt.u32.totalorder %s997_s30, %s1055_s3 }
 0x1be   : > { %p734_p1 = scmp.lt.u32.totalorder %s732_s7, %s728_s21  ;;  %p736_p8 = scmp.lt.u32.totalorder %s728_s21, %s997_s30 }
 0x1bf   : > { %p730_p7 = pnand %p729_p6, %p1063_p9 }
 0x1c0   : > { %p735_p3 = por %p734_p1, %p733_p12 }
 0x1c1   : > { %p731_p10 = pneg %p730_p7 }
 0x1c2   : > { %p737_p11 = por %p736_p8, %p735_p3 }
 0x1c4   : > { %p738_p0 = pnand %p737_p11, %p731_p10 }
 0x1c6   : > { %741 = shalt.err (!%p738_p0)
}
 0x1c7   : > { %s807_s22 = smov 256   ;;  %s808_s28 = smov 16  }
 0x1c8   : > { %599 = dma.vmem_to_hbm [thread:$0]  (%p1063_p9), %s990_s23, 1024, %s997_s30, %s450_s5, %s807_s22, %s807_s22, %s808_s28  }
 0x1c9 PF: > { %s480_s15 = sand.u32 1, %s776_s12   ;;  %p1064_p5 = scmp.ne.s32.totalorder %s1060_s27, 0 }
 0x1ca   : > { %p1065_p13 = scmp.ge.s32.totalorder %s796_s17, 2  ;;  %s481_s29 = scalar_lea.sflag [#allocation4], %s480_s15 }
 0x1cc   : > { %p606_p2 = pnand %p1065_p13, %p1064_p5 }
 0x1ce   : > { %771 = dma.done.wait (!%p606_p2), %s481_s29, 1024  }
 0x1cf   : > { %773 = vsyncadd (!%p606_p2), %s481_s29, 4294966272  ;;  %s19_s17 = sadd.s32 1, %s796_s17   ;;  %s1066_s12 = smov %s780_s13 }
 0x1d0   : > { %p16_p4 = scmp.ge.s32.totalorder %s19_s17, 4   ;;  %s1067_s13 = smov %s784_s14 }
 0x1d1   : > { %s1068_s14 = smov %s885_s26  ;;  %s1069_s15 = smov %s792_s16 }
 0x1d2   : > { %s1070_s16 = smov %s1072_s20  ;;  %18 = sbr.rel (!%p16_p4) target bundleno = 6 (0x6), region = 77 }
 0x1d9   :  { %486 = vsyncpa [#allocation3], 1 }
 0x1da   :  { %488 = vsyncpa [#allocation3 + $0x1], 1 }
 0x1db   :  { %489 = vsyncpa [#allocation4], 1 }
 0x1dc   :  { %491 = vsyncpa [#allocation4 + $0x1], 1 }

</bundles_post_ra>
